<compile_context>
chip_gen: v6e
topology: v6e:2x2x1
jax: 0.10.0
libtpu: 0.0.40
codegen_flags: <defaults>
</compile_context>

<pallas_src>
import jax
import jax.numpy as jnp
from jax import lax
from jax.experimental import pallas as pl
from jax.experimental.pallas import tpu as pltpu


def _round_up(x, m):
    return ((x + m - 1) // m) * m


def conv_prelu_kernel(p_ref, w_ref, b_ref, a_ref, o_ref):
    """One row tile: (bm, Kc) @ (Kc, Cp) on the MXU, + bias, then PReLU."""
    y = jnp.dot(p_ref[...], w_ref[...], preferred_element_type=jnp.float32)
    y = y + b_ref[...]                       # (1, Cp) f32 bias, broadcast over rows
    a = a_ref[...]                           # (1, Cp) f32 per-channel PReLU slope
    o_ref[...] = jnp.where(y > 0, y, a * y).astype(o_ref.dtype)


def _extract_patches(x_nhwc, ksize, stride):
    """im2col: (B,H,W,C) -> (B*Ho*Wo, K*K*C), minor ordering (ky, kx, c_in)."""
    B, H, W, C = x_nhwc.shape
    Ho = (H - ksize) // stride + 1
    Wo = (W - ksize) // stride + 1
    taps = []
    for ky in range(ksize):
        for kx in range(ksize):
            taps.append(
                x_nhwc[:, ky:ky + stride * (Ho - 1) + 1:stride,
                          kx:kx + stride * (Wo - 1) + 1:stride, :])
    patches = jnp.stack(taps, axis=3)                      # (B, Ho, Wo, K*K, C)
    return patches.reshape(B * Ho * Wo, ksize * ksize * C), Ho, Wo


def _choose_bm(M, block_m):
    """Row tile: as large as possible (HBM roofline), but with >= 2 grid steps
    when M allows (both v7x TensorCores get work) and bounded last-tile waste."""
    if M <= 16:
        return _round_up(M, 8)
    # Largest tile that still gives >= 2 grid steps; keep a multiple of 16
    # so bf16 sublane packing stays clean.
    bm = min(block_m, _round_up(-(-M // 2), 16))
    # Shrink if last-tile padding waste is excessive (> ~25%).
    while bm > 16 and (_round_up(M, bm) - M) / _round_up(M, bm) > 0.25:
        bm = _round_up(bm // 2, 16)
    return bm


def _invariant_spec(block_shape):
    """Grid-invariant operand: constant index_map (never re-DMAs); request a
    single buffer to save VMEM. Falls back cleanly on older jax."""
    try:
        return pl.BlockSpec(block_shape, lambda i: (0, 0),
                            pipeline_mode=pl.Buffered(1))
    except TypeError:  # pipeline_mode not supported -> default double-buffer
        return pl.BlockSpec(block_shape, lambda i: (0, 0))


def downsample(x, weight, bias, alpha, *, stride=2, block_m=512,
               compute_dtype=jnp.bfloat16, out_dtype=None, channels_last=False):
    """Forward pass of Downsample.

    x:      (B, C_in, H, W)    (PyTorch NCHW layout)
    weight: (C_out, C_in, K, K)
    bias:   (C_out,)
    alpha:  (C_out,)           PReLU per-channel slope
    returns (B, C_out, Ho, Wo)  (or (B, Ho, Wo, C_out) if channels_last=True)
    """
    B, C_in, H, W = x.shape
    C_out, _, K, _ = weight.shape
    out_dtype = x.dtype if out_dtype is None else out_dtype

    # ---- im2col (wrapper-side layout plumbing) ------------------------------
    # Cast to the compute dtype FIRST so every subsequent HBM pass (transpose,
    # patch gather, pad) moves half the bytes.
    x_nhwc = jnp.transpose(x.astype(compute_dtype), (0, 2, 3, 1))
    patches, Ho, Wo = _extract_patches(x_nhwc, K, stride)          # (M, Kc) bf16
    M, Kc = patches.shape

    # Weight reordered to (ky, kx, c_in) x c_out to match the patch ordering.
    w2d = jnp.transpose(weight.astype(compute_dtype), (2, 3, 1, 0)).reshape(Kc, C_out)

    # ---- tiling / padding ----------------------------------------------------
    # Contraction dim Kc is NOT padded: block uses the full dim (legal per the
    # (8,128)-or-full-dim rule); Mosaic pads lanes internally at zero HBM cost.
    Cp = _round_up(C_out, 128)               # lane-dense output dim (no vst.msk)
    bm = _choose_bm(M, block_m)
    M_p = _round_up(M, bm)

    patches = jnp.pad(patches, ((0, M_p - M), (0, 0)))             # fused w/ gather
    w2d = jnp.pad(w2d, ((0, 0), (0, Cp - C_out)))
    b2d = jnp.pad(bias.astype(jnp.float32), (0, Cp - C_out)).reshape(1, Cp)
    a2d = jnp.pad(alpha.astype(jnp.float32), (0, Cp - C_out)).reshape(1, Cp)

    # ---- VMEM budget (review: don't blanket-request 64 MiB on v7x) ----------
    in_sz = jnp.dtype(compute_dtype).itemsize
    out_sz = jnp.dtype(out_dtype).itemsize
    vmem_need = (2 * bm * Kc * in_sz          # patch tile, double-buffered
                 + 2 * bm * Cp * out_sz       # out tile, double-buffered
                 + Kc * Cp * in_sz            # weights (single-buffered)
                 + 2 * 2 * Cp * 4)            # bias + alpha
    vmem_limit = min(max(int(vmem_need * 1.5) + (2 << 20), 16 << 20), 48 << 20)

    grid = (M_p // bm,)
    out = pl.pallas_call(
        conv_prelu_kernel,
        out_shape=jax.ShapeDtypeStruct((M_p, Cp), out_dtype),
        grid_spec=pltpu.PrefetchScalarGridSpec(
            num_scalar_prefetch=0,
            grid=grid,
            in_specs=[
                pl.BlockSpec((bm, Kc), lambda i: (i, 0)),   # patch row tile
                _invariant_spec((Kc, Cp)),                  # weights
                _invariant_spec((1, Cp)),                   # bias
                _invariant_spec((1, Cp)),                   # PReLU slopes
            ],
            out_specs=pl.BlockSpec((bm, Cp), lambda i: (i, 0)),
        ),
        compiler_params=pltpu.CompilerParams(
            dimension_semantics=("parallel",),
            vmem_limit_bytes=vmem_limit),
    )(patches, w2d, b2d, a2d)

    out = out[:M, :C_out].reshape(B, Ho, Wo, C_out)
    if channels_last:
        return out                                           # skip NCHW transpose
    return jnp.transpose(out, (0, 3, 1, 2))


def downsample_reference(x, weight, bias, alpha, *, stride=2):
    """Pure-JAX f32 reference matching PyTorch Conv2d(stride=2, padding=0)+PReLU."""
    y = lax.conv_general_dilated(
        x, weight, window_strides=(stride, stride), padding='VALID',
        dimension_numbers=('NCHW', 'OIHW', 'NCHW'))
    y = y + bias[None, :, None, None]
    return jnp.where(y > 0, y, alpha[None, :, None, None] * y)


def init_params(key, in_dim, out_dim, ksize):
    """PyTorch-style defaults: uniform(+-1/sqrt(fan_in)), PReLU slope = 0.25."""
    kw, kb = jax.random.split(key)
    fan_in = in_dim * ksize * ksize
    bound = 1.0 / jnp.sqrt(jnp.float32(fan_in))
    weight = jax.random.uniform(kw, (out_dim, in_dim, ksize, ksize), jnp.float32,
                                -bound, bound)
    bias = jax.random.uniform(kb, (out_dim,), jnp.float32, -bound, bound)
    alpha = jnp.full((out_dim,), 0.25, jnp.float32)
    return weight, bias, alpha


if __name__ == "__main__":
    key = jax.random.PRNGKey(0)
    kx, kp = jax.random.split(key)

    B, C_in, H, W = 2, 4, 16, 16
    C_out, K = 8, 3

    x = jax.random.normal(kx, (B, C_in, H, W), jnp.float32)
    weight, bias, alpha = init_params(kp, C_in, C_out, K)

    out = downsample(x, weight, bias, alpha)
    out = jax.block_until_ready(out)

    ref = downsample_reference(x, weight, bias, alpha)
    Ho = (H - K) // 2 + 1
    assert out.shape == ref.shape == (B, C_out, Ho, Ho), (out.shape, ref.shape)
    # bf16 MXU operands with f32 accumulation -> slightly loosened tolerance.
    max_err = jnp.max(jnp.abs(out - ref))
    assert jnp.allclose(out, ref, atol=3e-2, rtol=3e-2), \
        f"mismatch: max abs err {max_err}"

    print("KERNEL_OK")
</pallas_src>

<mosaic_0001>
module attributes {stable_mosaic.version = 11 : i64} {
  func.func @conv_prelu_kernel(%arg0: i32, %arg1: memref<64x36xbf16, #tpu.memory_space<vmem>>, %arg2: memref<36x128xbf16, #tpu.memory_space<vmem>>, %arg3: memref<1x128xf32, #tpu.memory_space<vmem>>, %arg4: memref<1x128xf32, #tpu.memory_space<vmem>>, %arg5: memref<64x128xf32, #tpu.memory_space<vmem>>) attributes {dimension_semantics = [#tpu.dimension_semantics<parallel>], iteration_bounds = array<i64: 2>, scalar_prefetch = 0 : i64, scratch_operands = 0 : i64, tpu.core_type = #tpu.core_type<tc>, window_params = [{transform_indices = @transform_0, window_bounds = array<i64: 64, 36>}, {pipeline_mode = #tpu.pipeline_mode<synchronous>, transform_indices = @transform_1, window_bounds = array<i64: 36, 128>}, {pipeline_mode = #tpu.pipeline_mode<synchronous>, transform_indices = @transform_2, window_bounds = array<i64: 1, 128>}, {pipeline_mode = #tpu.pipeline_mode<synchronous>, transform_indices = @transform_3, window_bounds = array<i64: 1, 128>}, {transform_indices = @transform_4, window_bounds = array<i64: 64, 128>}]} {
    %c0 = arith.constant 0 : index
    %c0_0 = arith.constant 0 : index
    %0 = vector.load %arg1[%c0, %c0_0] : memref<64x36xbf16, #tpu.memory_space<vmem>>, vector<64x36xbf16>
    %c0_1 = arith.constant 0 : index
    %c0_2 = arith.constant 0 : index
    %1 = vector.load %arg2[%c0_1, %c0_2] : memref<36x128xbf16, #tpu.memory_space<vmem>>, vector<36x128xbf16>
    %cst = arith.constant dense<0.000000e+00> : vector<64x128xf32>
    %2 = tpu.matmul %0, %1, %cst {dimension_numbers = #tpu.dot_dimension_numbers<[1], [0], [0], [1], [0, 0, 1, 1], [], []>} : vector<64x36xbf16>, vector<36x128xbf16>, vector<64x128xf32> -> vector<64x128xf32>
    %c0_3 = arith.constant 0 : index
    %c0_4 = arith.constant 0 : index
    %3 = vector.load %arg3[%c0_3, %c0_4] : memref<1x128xf32, #tpu.memory_space<vmem>>, vector<1x128xf32>
    %4 = vector.broadcast %3 : vector<1x128xf32> to vector<64x128xf32>
    %5 = arith.addf %2, %4 : vector<64x128xf32>
    %c0_5 = arith.constant 0 : index
    %c0_6 = arith.constant 0 : index
    %6 = vector.load %arg4[%c0_5, %c0_6] : memref<1x128xf32, #tpu.memory_space<vmem>>, vector<1x128xf32>
    %cst_7 = arith.constant 0.000000e+00 : f32
    %7 = vector.broadcast %cst_7 : f32 to vector<64x128xf32>
    %8 = arith.cmpf ogt, %5, %7 : vector<64x128xf32>
    %9 = vector.broadcast %6 : vector<1x128xf32> to vector<64x128xf32>
    %10 = arith.mulf %9, %5 : vector<64x128xf32>
    %11 = arith.select %8, %5, %10 : vector<64x128xi1>, vector<64x128xf32>
    %c0_8 = arith.constant 0 : index
    %c0_9 = arith.constant 0 : index
    %12 = vector.load %arg5[%c0_8, %c0_9] : memref<64x128xf32, #tpu.memory_space<vmem>>, vector<64x128xf32>
    tpu.vector_store %arg5[%c0_8, %c0_9], %11 {strides = array<i32>} : memref<64x128xf32, #tpu.memory_space<vmem>>, vector<64x128xf32>,
    return
  }
  func.func @transform_0(%arg0: i32) -> (i32, i32) {
    %c0_i32 = arith.constant 0 : i32
    %c0_i32_0 = arith.constant 0 : i32
    return %arg0, %c0_i32 : i32, i32
  }
  func.func @transform_1(%arg0: i32) -> (i32, i32) {
    %c0_i32 = arith.constant 0 : i32
    %c0_i32_0 = arith.constant 0 : i32
    %c0_i32_1 = arith.constant 0 : i32
    return %c0_i32, %c0_i32_0 : i32, i32
  }
  func.func @transform_2(%arg0: i32) -> (i32, i32) {
    %c0_i32 = arith.constant 0 : i32
    %c0_i32_0 = arith.constant 0 : i32
    %c0_i32_1 = arith.constant 0 : i32
    return %c0_i32, %c0_i32_0 : i32, i32
  }
  func.func @transform_3(%arg0: i32) -> (i32, i32) {
    %c0_i32 = arith.constant 0 : i32
    %c0_i32_0 = arith.constant 0 : i32
    %c0_i32_1 = arith.constant 0 : i32
    return %c0_i32, %c0_i32_0 : i32, i32
  }
  func.func @transform_4(%arg0: i32) -> (i32, i32) {
    %c0_i32 = arith.constant 0 : i32
    %c0_i32_0 = arith.constant 0 : i32
    return %arg0, %c0_i32 : i32, i32
  }
}

</mosaic_0001>

<bundles_post_ra>
// kernel: tpu_custom_call.1
= control target key start
LH: loop header
LB: loop body
LE: loop exit
PB: predicated region body
PF: predicated region fallthrough
CT: control target
= control target key end

     0   :  { %9 = vsyncpa [#allocation3], 0  ;;  %s776_s0 = inlined_call_operand.vmem [shape: bf16[128,36], index: 0, kind: input, shape index: {}]   ;;  %s777_s1 = inlined_call_operand.vmem [shape: bf16[36,128], index: 1, kind: input, shape index: {}]   ;;  %s778_s2 = inlined_call_operand.vmem [shape: f32[1,128], index: 2, kind: input, shape index: {}]   ;;  %s779_s3 = inlined_call_operand.vmem [shape: f32[1,128], index: 3, kind: input, shape index: {}]   ;;  %s780_s4 = inlined_call_operand.hbm [shape: f32[128,128], index: 4, kind: output, shape index: {}]  }
   0x1   :  { %11 = vsyncpa [#allocation3 + $0x1], 0  ;;  %s645_s15 = smov 0   ;;  %s647_s16 = smov 0  }
   0x2   :  { %s649_s17 = smov 0   ;;  %s651_s18 = smov 0  }
   0x3 LB: > { %s666_s19 = sadd.s32 4294967295, %s615_s18   ;;  %s452_s20 = sadd.s32 4294967294, %s615_s18   ;;  %s615_s18 = sphi %s651_s18, %s786_s18   ;;  %s611_s17 = sphi %s649_s17, %s785_s17   ;;  %s607_s16 = sphi %s647_s16, %s784_s16   ;;  %s603_s15 = sphi %s645_s15, %s783_s15  }
   0x4   : > { %s670_s21 = sadd.s32 1, %s615_s18   ;;  %s113_s22 = sadd.s32 1, %s611_s17 }
   0x5   : > { %s110_s23 = ssub.s32 %s615_s18, %s670_s21  ;;  %p123_p0 = scmp.ne.s32.totalorder %s611_s17, %s607_s16 }
   0x6   : > { %p111_p1 = scmp.eq.s32.totalorder %s110_s23, 0  ;;  %p124_p2 = scmp.eq.s32.totalorder %s666_s19, 1 }
   0x7   : > { %p129_p3 = scmp.ne.s32.totalorder %s607_s16, %s603_s15  ;;  %p130_p4 = scmp.eq.s32.totalorder %s452_s20, 1 }
   0x8   : > { %s681_s24 = scalar_select %p111_p1, %s611_s17, %s113_s22  }
   0x9   : > { %p683_p5 = por %p124_p2, %p123_p0  ;;  %p687_p6 = por %p130_p4, %p129_p3 }
   0xa   : > { %p455_p7 = scmp.ge.s32.totalorder %s615_s18, 1  ;;  %p166_p8 = scmp.lt.s32.totalorder %s615_s18, 3 }
   0xc   : > { %p167_p9 = pnand %p455_p7, %p166_p8 }
   0xd   : > { %s457_s5 = sshll.u32 (!%p167_p9), %s666_s19, 3  ;;  %s189_s12 = sand.u32 (!%p167_p9), 1, %s607_s16  }
   0xe   : > { %170 = sbr.rel (%p167_p9) target bundleno = 251 (0xfb), region = 36  ;;  %p193_p10 = scmp.lt.s32.totalorder (!%p167_p9), %s457_s5, 15 }
   0xf   : > { %s456_s20 = sshll.u32 (!%p167_p9), %s189_s12, 6  ;;  %s477_s28 = sshll.u32 (!%p167_p9), %s666_s19, 10 }
  0x10   : > { %s715_s27 = scalar_lea.vmem (!%p167_p9), [#allocation2], %s456_s20  ;;  %s736_s6 = scalar_lea.sflag (!%p167_p9), [#allocation3], %s189_s12 }
  0x11   : > { %s390_s29 = sshll.u32 (!%p167_p9), %s715_s27, 4  ;;  %s730_s29 = int_to_ptr.vmem [resolvable:$true] %s390_s29 }
  0x12   : > { %s555_s7 = scalar_lea.vmem (!%p167_p9), %s730_s29, 1024 }
  0x13   : > { %v548_v0 = vld [vmem:[%s777_s1 + $0x10] ss:$0 sps:$4 sm:$0x33]   ;;  %vm268_vm0 = vcmask 1041408   ;;  %v549_v1 = vld [vmem:[%s777_s1 + $0x8] sm:$0xff]   ;;  %v550_v3 = vld [vmem:[%s777_s1] sm:$0xff]   ;;  %p556_p11 = scmp.ne.s32.totalorder %s730_s29, %s555_s7 }
  0x14   : > { %505 = vmatprep.subr.msk.bf16.mxu0 %vm268_vm0, %v548_v0  ;;  %506 = vmatprep.subr.msk.bf16.mxu1 %vm268_vm0, %v548_v0  ;;  %v270_v2 = vsel %vm268_vm0, %v548_v0, 0  ;;  %s788_s5 = smov (!%p193_p10, %s457_s5), 15  ;;  %vm255_vm1 = vcmask 293888   ;;  %v459_v8 = vld [vmem:[%s778_s2] ss:$0 sm:$0xff] }
  0x15   : > { %486 = vmatpush3.bf16.msra.mxu0 %v270_v2  ;;  %502 = vmatpush3.bf16.msra.mxu1 %v270_v2  ;;  %s458_s8 = sshll.u32 %s788_s5, 2  ;;  %v471_v10 = vld [vmem:[%s779_s3] ss:$0 sm:$0xff]  ;;  %s728_s5 = scalar_lea.hbm %s780_s4, %s477_s28 }
  0x16   : > { %487 = vmatprep.subr.bf16.mxu0 %v549_v1  ;;  %500 = vmatprep.subr.bf16.mxu1 %v549_v1  ;;  %s196_s11 = scalar_lea.vmem %s776_s0, %s458_s8  ;;  %p557_p12 = pnand %p556_p11, %p683_p5 }
  0x17   : > { %v551_v4 = vld [vmem:[%s196_s11] sm:$0xff]   ;;  %v552_v5 = vld [vmem:[%s196_s11 + $0x10] sm:$0xff]   ;;  %v553_v6 = vld [vmem:[%s196_s11 + $0x8] sm:$0xff]   ;;  %s617_s8 = smov [#allocation2]  }
  0x18   : > { %491 = vmatprep.mubr.msk.bf16.mxu0 %vm255_vm1, %v551_v4  ;;  %495 = vmatprep.mubr.msk.bf16.mxu1 %vm255_vm1, %v552_v5  ;;  %v554_v7 = vld [vmem:[%s196_s11 + $0x18] sm:$0xff]   ;;  %p558_p13 = pneg %p557_p12  ;;  %s559_s9 = sshll.u32 %s617_s8, 4  ;;  %s560_s9 = int_to_ptr.vmem [resolvable:$false] %s559_s9 }
  0x19   : > { %488 = vmatpush3.bf16.msra.mxu0 %v549_v1  ;;  %503 = vmatpush3.bf16.msra.mxu1 %v549_v1  ;;  %s561_s10 = scalar_lea.vmem %s560_s9, 2048  ;;  %p562_p0 = scmp.lt.s32.totalorder %s730_s29, %s560_s9 }
  0x1a   : > { %489 = vmatprep.subr.bf16.mxu0 %v550_v3  ;;  %501 = vmatprep.subr.bf16.mxu1 %v550_v3  ;;  %p563_p1 = scmp.lt.s32.totalorder %s561_s10, %s555_s7 }
  0x1c   : > { %p564_p2 = por %p563_p1, %p562_p0 }
  0x1d   : > { %490 = vmatpush3.bf16.msra.mxu0 %v550_v3  ;;  %504 = vmatpush3.bf16.msra.mxu1 %v550_v3 }
  0x1e   : > { %p565_p3 = pnand %p564_p2, %p558_p13 }
  0x20   : > { %492 = vmatmul.mubr.msk.bf16.vlgmr.msra.gmra.mxu0 %vm255_vm1, %v553_v6  ;;  %496 = vmatmul.mubr.msk.bf16.vlgmr.msra.gmra.mxu1 %vm255_vm1, %v554_v7 }
  0xe0   : > { %v493_v9 = vpop.f32.mrf.mxu0  ;;  %v497_v11 = vpop.f32.mrf.mxu1 }
  0xe1   : > { %v315_v12 = vadd.f32 %v493_v9, %v459_v8  ;;  %v331_v13 = vadd.f32 %v497_v11, %v459_v8 }
  0xe2   : > { %v306_v14 = vpop.f32.mrf.mxu0  ;;  %v322_v15 = vpop.f32.mrf.mxu1 }
  0xe3   : > { %vm340_vm2 = vcmp.gt.f32.partialorder %v315_v12, 0.0  ;;  %v354_v16 = vmul.f32 %v471_v10, %v315_v12  ;;  %vm344_vm3 = vcmp.gt.f32.partialorder %v331_v13, 0.0  ;;  %v358_v17 = vmul.f32 %v471_v10, %v331_v13 }
  0xe4   : > { %v307_v18 = vadd.f32 %v459_v8, %v306_v14  ;;  %v323_v19 = vadd.f32 %v459_v8, %v322_v15  ;;  %v494_v20 = vpop.f32.mrf.mxu0  ;;  %v498_v21 = vpop.f32.mrf.mxu1 }
  0xe5   : > { %v362_v22 = vsel %vm340_vm2, %v315_v12, %v354_v16  ;;  %v366_v23 = vsel %vm344_vm3, %v331_v13, %v358_v17  ;;  %v318_v24 = vadd.f32 %v494_v20, %v459_v8  ;;  %v334_v25 = vadd.f32 %v498_v21, %v459_v8 }
  0xe6   : > { %370 = vst [vmem:[%s715_s27 + $0x10] sm:$0xff] %v362_v22  ;;  %374 = vst [vmem:[%s715_s27 + $0x30] sm:$0xff] %v366_v23  ;;  %vm338_vm4 = vcmp.gt.f32.partialorder %v307_v18, 0.0  ;;  %v352_v26 = vmul.f32 %v471_v10, %v307_v18  ;;  %vm342_vm5 = vcmp.gt.f32.partialorder %v323_v19, 0.0  ;;  %v356_v27 = vmul.f32 %v471_v10, %v323_v19  ;;  %v309_v28 = vpop.f32.mrf.mxu0  ;;  %v325_v29 = vpop.f32.mrf.mxu1 }
  0xe7   : > { %vm341_vm6 = vcmp.gt.f32.partialorder %v318_v24, 0.0  ;;  %v355_v30 = vmul.f32 %v471_v10, %v318_v24  ;;  %vm345_vm7 = vcmp.gt.f32.partialorder %v334_v25, 0.0  ;;  %v359_v31 = vmul.f32 %v471_v10, %v334_v25 }
  0xe8   : > { %v360_v32 = vsel %vm338_vm4, %v307_v18, %v352_v26  ;;  %v364_v33 = vsel %vm342_vm5, %v323_v19, %v356_v27  ;;  %v310_v34 = vadd.f32 %v459_v8, %v309_v28  ;;  %v326_v35 = vadd.f32 %v459_v8, %v325_v29 }
  0xe9   : > { %368 = vst [vmem:[%s715_s27] sm:$0xff] %v360_v32  ;;  %372 = vst [vmem:[%s715_s27 + $0x20] sm:$0xff] %v364_v33  ;;  %v363_v36 = vsel %vm341_vm6, %v318_v24, %v355_v30  ;;  %v367_v37 = vsel %vm345_vm7, %v334_v25, %v359_v31 }
  0xea   : > { %371 = vst [vmem:[%s715_s27 + $0x18] sm:$0xff] %v363_v36  ;;  %375 = vst [vmem:[%s715_s27 + $0x38] sm:$0xff] %v367_v37  ;;  %vm339_vm8 = vcmp.gt.f32.partialorder %v310_v34, 0.0  ;;  %v353_v38 = vmul.f32 %v471_v10, %v310_v34  ;;  %vm343_vm9 = vcmp.gt.f32.partialorder %v326_v35, 0.0  ;;  %v357_v39 = vmul.f32 %v471_v10, %v326_v35 }
  0xec   : > { %v361_v40 = vsel %vm339_vm8, %v310_v34, %v353_v38  ;;  %v365_v41 = vsel %vm343_vm9, %v326_v35, %v357_v39 }
  0xed   : > { %369 = vst [vmem:[%s715_s27 + $0x8] sm:$0xff] %v361_v40  ;;  %373 = vst [vmem:[%s715_s27 + $0x28] sm:$0xff] %v365_v41 }
  0xee   : > { %568 = shalt.err (!%p565_p3)
}
  0xef   : > { %s569_s11 = scalar_lea.hbm %s728_s5, 1024  ;;  %s573_s14 = scalar_lea.hbm %s780_s4, 2048 }
  0xf0   : > { %p570_p4 = scmp.ne.s32.totalorder %s728_s5, %s569_s11  ;;  %p574_p9 = scmp.lt.s32.totalorder %s728_s5, %s780_s4 }
  0xf1   : > { %p575_p10 = scmp.lt.s32.totalorder %s573_s14, %s569_s11 }
  0xf2   : > { %p571_p7 = pnand %p570_p4, %p683_p5 }
  0xf3   : > { %p576_p11 = por %p575_p10, %p574_p9 }
  0xf4   : > { %p572_p8 = pneg %p571_p7 }
  0xf6   : > { %p577_p12 = pnand %p576_p11, %p572_p8 }
  0xf8   : > { %580 = shalt.err (!%p577_p12)
}
  0xf9   : > { %s618_s23 = smov 128   ;;  %s619_s27 = smov 8  }
  0xfa   : > { %507 = dma.vmem_to_hbm [thread:$0]  (%p683_p5), %s730_s29, 1024, %s728_s5, %s736_s6, %s618_s23, %s618_s23, %s619_s27  }
  0xfb PF: > { %p513_p13 = scmp.ge.s32.totalorder %s615_s18, 2  ;;  %s405_s28 = sand.u32 1, %s603_s15  }
  0xfc   : > { %s406_s19 = scalar_lea.sflag [#allocation3], %s405_s28 }
  0xfd   : > { %p510_p0 = pnand %p513_p13, %p687_p6 }
  0xff   : > { %p511_p1 = pneg %p510_p0 }
 0x101   : > { %598 = dma.done.wait (%p511_p1), %s406_s19, 1024  }
 0x102   : > { %600 = vsyncadd (%p511_p1), %s406_s19, 4294966272  ;;  %p14_p2 = scmp.ge.s32.totalorder %s670_s21, 4   ;;  %s783_s15 = smov %s607_s16 }
 0x103   : > { %s784_s16 = smov %s611_s17  ;;  %s785_s17 = smov %s681_s24 }
 0x104   : > { %s786_s18 = smov %s670_s21  ;;  %16 = sbr.rel (!%p14_p2) target bundleno = 3 (0x3), region = 71 }
 0x109   :  { %411 = vsyncpa [#allocation3], 1 }
 0x10a   :  { %413 = vsyncpa [#allocation3 + $0x1], 1 }

</bundles_post_ra>
